<compile_context>
chip_gen: v6e
topology: v6e:2x2x1
jax: 0.10.0
libtpu: 0.0.40
codegen_flags: <defaults>
</compile_context>

<pallas_src>
import math

import jax
import jax.numpy as jnp
from jax.experimental import pallas as pl
from jax.experimental.pallas import tpu as pltpu

_MIN_PIXEL_STEPS = 8          # min grid steps / batch elem for pipelining + megacore
_SMALL_SLAB_BYTES = 2 << 20   # below this, a single tile per batch elem is fine


def _round_up(v: int, m: int) -> int:
    return ((v + m - 1) // m) * m


def _color_curve_kernel(power_ref, x_ref, o_ref):
    # power_ref: SMEM (B,) f32 scalar-prefetch; x_ref/o_ref: VMEM (1, TR, LANE)
    b = pl.program_id(0)
    p = power_ref[b]
    x = x_ref[...].astype(jnp.float32)
    ax = jnp.abs(x)
    # power > 0 is guaranteed by U(0.5, 2.0): exp(p * log(0)) = exp(-inf) = 0
    # exactly, so no zero-guard is needed.  (Out-of-range lanes of a partial
    # trailing block may produce inf/NaN here; they are dropped on store.)
    mag = jnp.exp(p * jnp.log(ax))
    # Bit-level copysign on the f32 intermediate: OR x's sign bit into the
    # non-negative magnitude (3 VPU bit ops, no compare/select/multiply).
    sign_bits = pltpu.bitcast(x, jnp.uint32) & jnp.uint32(0x80000000)
    out = pltpu.bitcast(pltpu.bitcast(mag, jnp.uint32) | sign_bits, jnp.float32)
    o_ref[...] = out.astype(o_ref.dtype)


def random_color_curve(x: jax.Array, power: jax.Array) -> jax.Array:
    """x: (B, C, H, W) float; power: (B,) float (the U(0.5, 2.0) draw)."""
    orig_shape = x.shape
    orig_dtype = x.dtype
    B = x.shape[0]
    N = math.prod(x.shape[1:])

    # Keep kernel I/O in the input dtype (bandwidth-bound op); only exotic
    # dtypes fall back to f32.
    if any(x.dtype == d for d in (jnp.float32, jnp.bfloat16, jnp.float16)):
        io_dtype = x.dtype
        xf = x.reshape(B, N)
    else:
        io_dtype = jnp.float32
        xf = x.reshape(B, N).astype(io_dtype)

    # Lane-dense tiling: prefer the widest lane in {512, 256, 128} that
    # divides N exactly so no pad/crop HBM passes are needed.
    lane = 128
    for cand in (512, 256):
        if N % cand == 0:
            lane = cand
            break

    n_pad = _round_up(N, lane)
    padded = n_pad != N  # only possible when lane == 128
    if padded:
        # Rare fallback: pad only the small tail.  Zero padding is exact
        # under the math (exp(p * log 0) = 0).
        xf = jnp.pad(xf, ((0, 0), (0, n_pad - N)))
    rows = n_pad // lane
    xt = xf.reshape(B, rows, lane)

    itemsize = xt.dtype.itemsize
    sublane_mult = {4: 8, 2: 16, 1: 32}[itemsize]  # f32 / bf16-f16 / 8-bit

    # Per-chip tile budget.
    try:
        vmem_cap = int(pltpu.get_tpu_info().vmem_capacity_bytes)
    except Exception:
        vmem_cap = None
    if vmem_cap is not None and vmem_cap <= (64 << 20):
        # v7x: 3.2 TB/s HBM makes the ~0.35 us per-step overhead significant;
        # ~4 MiB tiles, double-buffered in+out = 16 MiB, needs an explicit
        # scoped-VMEM raise but stays well inside the 64 MiB physical VMEM.
        max_tile_bytes = 4 << 20
        vmem_limit = 48 << 20
    else:
        # v5e / v6e (or unknown): 2 MiB tiles fit the 16/32 MiB default
        # scoped VMEM double-buffered; bigger buys little at <=1.4 TB/s.
        max_tile_bytes = 2 << 20
        vmem_limit = None

    tile_rows = max(sublane_mult,
                    (max_tile_bytes // (lane * itemsize)) // sublane_mult * sublane_mult)
    slab_bytes = rows * lane * itemsize
    if slab_bytes > _SMALL_SLAB_BYTES:
        # Guarantee enough pixel-axis steps so the pipeliner can overlap
        # DMA with compute and both v7x cores have work even when B == 1.
        cap = _round_up(pl.cdiv(rows, _MIN_PIXEL_STEPS), sublane_mult)
        tile_rows = min(tile_rows, max(sublane_mult, cap))
    if rows <= tile_rows:
        tile_rows = rows  # single full-dim block; always a legal block shape
    num_tiles = pl.cdiv(rows, tile_rows)  # last block may be partial (masked)

    total = B * N
    cost = pl.CostEstimate(
        flops=5 * total,                    # abs + mul + 3 bit ops per element
        transcendentals=2 * total,          # log + exp per element
        bytes_accessed=2 * total * itemsize,
    )

    cp_kwargs = dict(dimension_semantics=("parallel", "parallel"))
    if vmem_limit is not None:
        cp_kwargs["vmem_limit_bytes"] = vmem_limit

    out = pl.pallas_call(
        _color_curve_kernel,
        out_shape=jax.ShapeDtypeStruct((B, rows, lane), xt.dtype),
        grid_spec=pltpu.PrefetchScalarGridSpec(
            num_scalar_prefetch=1,
            grid=(B, num_tiles),
            in_specs=[
                pl.BlockSpec((1, tile_rows, lane), lambda b, t, pw: (b, t, 0))
            ],
            out_specs=pl.BlockSpec(
                (1, tile_rows, lane), lambda b, t, pw: (b, t, 0)
            ),
        ),
        compiler_params=pltpu.CompilerParams(**cp_kwargs),
        cost_estimate=cost,
    )(power.reshape(-1).astype(jnp.float32), xt)

    if padded:
        out = out.reshape(B, n_pad)[:, :N]
    out = out.reshape(orig_shape)
    if out.dtype != orig_dtype:
        out = out.astype(orig_dtype)
    return out


if __name__ == "__main__":
    key = jax.random.PRNGKey(0)
    k_x, k_p = jax.random.split(key)

    B, C, H, W = 2, 4, 16, 16
    x = jax.random.normal(k_x, (B, C, H, W), dtype=jnp.float32)
    # Per-batch power draw, equivalent to torch.empty(B,1,1,1).uniform_(0.5, 2.0)
    power = jax.random.uniform(k_p, (B,), dtype=jnp.float32, minval=0.5, maxval=2.0)

    out = jax.block_until_ready(random_color_curve(x, power))

    # Silent correctness check against the pure-JAX reference.
    ref = jnp.abs(x) ** power.reshape(B, 1, 1, 1) * jnp.sign(x)
    assert out.shape == (B, C, H, W)
    assert out.dtype == x.dtype
    assert jnp.allclose(out, ref, atol=1e-5, rtol=1e-5)

    print("KERNEL_OK")
</pallas_src>

<mosaic_0001>
module attributes {stable_mosaic.version = 11 : i64} {
  func.func @_color_curve_kernel(%arg0: i32, %arg1: i32, %arg2: memref<2xf32, #tpu.memory_space<smem>>, %arg3: memref<1x2x512xf32, #tpu.memory_space<vmem>>, %arg4: memref<1x2x512xf32, #tpu.memory_space<vmem>>) attributes {dimension_semantics = [#tpu.dimension_semantics<parallel>, #tpu.dimension_semantics<parallel>], iteration_bounds = array<i64: 2, 1>, scalar_prefetch = 1 : i64, scratch_operands = 0 : i64, tpu.core_type = #tpu.core_type<tc>, window_params = [{transform_indices = @transform_0, window_bounds = array<i64: 1, 2, 512>}, {transform_indices = @transform_1, window_bounds = array<i64: 1, 2, 512>}]} {
    %0 = arith.index_cast %arg0 : i32 to index
    %1 = memref.load %arg2[%0] : memref<2xf32, #tpu.memory_space<smem>>
    %c0 = arith.constant 0 : index
    %c0_0 = arith.constant 0 : index
    %c0_1 = arith.constant 0 : index
    %2 = vector.load %arg3[%c0, %c0_0, %c0_1] : memref<1x2x512xf32, #tpu.memory_space<vmem>>, vector<1x2x512xf32>
    %3 = math.absf %2 : vector<1x2x512xf32>
    %4 = math.log %3 : vector<1x2x512xf32>
    %5 = vector.broadcast %1 : f32 to vector<1x2x512xf32>
    %6 = arith.mulf %5, %4 : vector<1x2x512xf32>
    %7 = math.exp %6 : vector<1x2x512xf32>
    %8 = tpu.bitcast %2 : vector<1x2x512xf32> -> vector<1x2x512xi32>
    %c-2147483648_i32 = arith.constant -2147483648 : i32
    %9 = vector.broadcast %c-2147483648_i32 : i32 to vector<1x2x512xi32>
    %10 = arith.andi %8, %9 : vector<1x2x512xi32>
    %11 = tpu.bitcast %7 : vector<1x2x512xf32> -> vector<1x2x512xi32>
    %12 = arith.ori %11, %10 : vector<1x2x512xi32>
    %13 = tpu.bitcast %12 : vector<1x2x512xi32> -> vector<1x2x512xf32>
    %c0_2 = arith.constant 0 : index
    %c0_3 = arith.constant 0 : index
    %c0_4 = arith.constant 0 : index
    %14 = vector.load %arg4[%c0_2, %c0_3, %c0_4] : memref<1x2x512xf32, #tpu.memory_space<vmem>>, vector<1x2x512xf32>
    tpu.vector_store %arg4[%c0_2, %c0_3, %c0_4], %13 {strides = array<i32>} : memref<1x2x512xf32, #tpu.memory_space<vmem>>, vector<1x2x512xf32>,
    return
  }
  func.func @transform_0(%arg0: i32, %arg1: i32, %arg2: memref<2xf32, #tpu.memory_space<smem>>) -> (i32, i32, i32) {
    %c0_i32 = arith.constant 0 : i32
    %c0_i32_0 = arith.constant 0 : i32
    return %arg0, %arg1, %c0_i32 : i32, i32, i32
  }
  func.func @transform_1(%arg0: i32, %arg1: i32, %arg2: memref<2xf32, #tpu.memory_space<smem>>) -> (i32, i32, i32) {
    %c0_i32 = arith.constant 0 : i32
    %c0_i32_0 = arith.constant 0 : i32
    return %arg0, %arg1, %c0_i32 : i32, i32, i32
  }
}

</mosaic_0001>

<bundles_post_ra>
// kernel: tpu_custom_call.1
= control target key start
LH: loop header
LB: loop body
LE: loop exit
PB: predicated region body
PF: predicated region fallthrough
CT: control target
= control target key end

     0   :  { %s535_s9 = smov [#allocation3]   ;;  %s696_s0 = inlined_call_operand.hbm [shape: f32[2], index: 0, kind: input, shape index: {}]   ;;  %s697_s1 = inlined_call_operand.hbm [shape: f32[2,2,512], index: 1, kind: input, shape index: {}]   ;;  %s698_s2 = inlined_call_operand.hbm [shape: f32[2,2,512], index: 2, kind: output, shape index: {}]  }
   0x1   :  { %8 = dma.hbm_to_smem %s696_s0, 16, %s535_s9, [#allocation2] }
   0x2   :  { %501 = dma.done.wait [#allocation2], 16 }
   0x3   :  { %502 = vsyncadd [#allocation2], 4294967280 }
   0x4   :  { %10 = sfence }
   0x5   :  { %11 = vsyncpa [#allocation5], 0 }
   0x6   :  { %13 = vsyncpa [#allocation5 + $0x1], 0 }
   0x7   :  { %14 = vsyncpa [#allocation6], 0 }
   0x8   :  { %16 = vsyncpa [#allocation6 + $0x1], 0  ;;  %s557_s12 = smov 0   ;;  %s559_s13 = smov 0  }
   0x9   :  { %s561_s14 = smov 0   ;;  %s563_s15 = smov 0  }
   0xa   :  { %s565_s16 = smov 0   ;;  %s567_s17 = smov 0  }
   0xb LB: > { %s329_s0 = sadd.s32 4294967295, %s533_s17   ;;  %s330_s18 = sadd.s32 4294967294, %s533_s17   ;;  %s533_s17 = sphi %s567_s17, %s22_s17   ;;  %s529_s16 = sphi %s565_s16, %s710_s16   ;;  %s525_s15 = sphi %s563_s15, %s709_s15   ;;  %s521_s14 = sphi %s561_s14, %s708_s14   ;;  %s517_s13 = sphi %s559_s13, %s707_s13   ;;  %s513_s12 = sphi %s557_s12, %s706_s12  }
   0xc   : > { %s34_s19 = sadd.s32 1, %s529_s16  ;;  %s43_s20 = sadd.s32 1, %s521_s14 }
   0xd   : > { %p36_p0 = scmp.ge.s32.totalorder %s34_s19, 2  ;;  %p50_p1 = scmp.ne.s32.totalorder %s521_s14, %s517_s13 }
   0xe   : > { %p51_p2 = scmp.eq.s32.totalorder %s533_s17, 0  ;;  %p56_p3 = scmp.ne.s32.totalorder %s517_s13, %s513_s12 }
   0xf   : > { %s712_s19 = smov (%p36_p0, %s34_s19), 0  ;;  %p57_p5 = scmp.eq.s32.totalorder %s329_s0, 0 }
  0x10   : > { %p598_p4 = por %p51_p2, %p50_p1  ;;  %s38_s22 = ssub.s32 %s529_s16, %s712_s19 }
  0x11   : > { %p82_p6 = scmp.eq.s32.totalorder %s329_s0, 1  ;;  %p41_p7 = scmp.eq.s32.totalorder %s38_s22, 0 }
  0x12   : > { %p604_p8 = por %p57_p5, %p56_p3  ;;  %p88_p10 = scmp.eq.s32.totalorder %s330_s18, 1 }
  0x13   : > { %p608_p9 = por %p82_p6, %p50_p1  ;;  %p358_p13 = scmp.lt.s32.totalorder %s533_s17, 2 }
  0x14   : > { %s613_s25 = scalar_select %p41_p7, %s521_s14, %s43_s20  }
  0x15   : > { %p615_p11 = por %p88_p10, %p56_p3  ;;  %s108_s27 = sand.u32 1, %s521_s14  }
  0x16   : > { %s333_s28 = sshll.u32 %s108_s27, 3  ;;  %s344_s29 = sshll.u32 %s529_s16, 7 }
  0x17   : > { %s702_s26 = scalar_select %p615_p11, 1, 0 }
  0x18   : > { %s120_s4 = scalar_lea.hbm %s697_s1, %s344_s29  ;;  %s112_s5 = scalar_lea.vmem [#allocation4], %s333_s28 }
  0x19   : > { %s122_s6 = sshll.u32 %s112_s5, 4  ;;  %p628_p0 = pnand %p358_p13, %p598_p4  ;;  %s123_s6 = int_to_ptr.vmem [resolvable:$true] %s122_s6 }
  0x1a   : > { %p336_p1 = scmp.ge.s32.totalorder %s533_s17, 1  ;;  %p127_p2 = scmp.lt.s32.totalorder %s533_s17, 3 }
  0x1b   : > { %s109_s8 = scalar_lea.sflag [#allocation5], %s108_s27  ;;  %p425_p3 = pneg %p628_p0 }
  0x1c   : > { %s436_s9 = scalar_lea.vmem %s123_s6, 128  ;;  %s536_s10 = smov [#allocation4]  }
  0x1d   : > { %p437_p5 = scmp.ne.s32.totalorder %s123_s6, %s436_s9  ;;  %s441_s11 = sshll.u32 %s536_s10, 4  ;;  %s442_s11 = int_to_ptr.vmem [resolvable:$false] %s441_s11 }
  0x1e   : > { %s443_s0 = scalar_lea.vmem %s442_s11, 256  ;;  %p444_p10 = scmp.lt.s32.totalorder %s123_s6, %s442_s11 }
  0x1f   : > { %p439_p6 = pnand %p437_p5, %p425_p3  ;;  %p445_p12 = scmp.lt.s32.totalorder %s443_s0, %s436_s9 }
  0x21   : > { %p440_p7 = pneg %p439_p6  ;;  %p446_p4 = por %p445_p12, %p444_p10 }
  0x23   : > { %p447_p13 = pnand %p446_p4, %p440_p7 }
  0x25   : > { %450 = shalt.err (!%p447_p13)
}
  0x26   : > { %353 = dma.hbm_to_vmem [thread:$0]  (!%p628_p0), %s120_s4, 128, %s123_s6, %s109_s8  }
  0x27   : > { %p128_p11 = pnand %p336_p1, %p127_p2 }
  0x28   : > { %s643_s18 = sand.u32 (!%p128_p11), 1, %s517_s13  }
  0x29   : > { %131 = sbr.rel (%p128_p11) target bundleno = 111 (0x6f), region = 24  ;;  %s337_s20 = sshll.u32 (!%p128_p11), %s643_s18, 3 }
  0x2a   : > { %s134_s21 = scalar_lea.sflag (!%p128_p11), [#allocation5], %s643_s18  ;;  %s137_s22 = scalar_lea.vmem (!%p128_p11), [#allocation4], %s337_s20 }
  0x2e   : > { %504 = dma.done.wait (%p604_p8), %s134_s21, 128  }
  0x2f   : > { %506 = vsyncadd (%p604_p8), %s134_s21, 4294967168  ;;  %v157_v0 = vld [vmem:[%s137_s22] sm:$0xff]  ;;  %s156_s27 = sld [smem:[#allocation3 + %s525_s15]]  ;;  %v537_v5 = vmov 1983009808   ;;  %v170_v7 = vlaneseq  ;;  %s155_s23 = scalar_lea.vmem [#allocation7], %s337_s20 }
  0x30   : > { %v158_v1 = vand.u32 2147483647, %v157_v0  ;;  %v168_v6 = vunpack.c.l.s4 %v537_v5  ;;  %v166_v13 = vcombine.high %v157_v0, %v157_v0  ;;  %s245_s28 = sshll.u32 %s155_s23, 4  ;;  %s345_s29 = sshll.u32 %s525_s15, 7  ;;  %s246_s28 = int_to_ptr.vmem [resolvable:$true] %s245_s28 }
  0x31   : > { %v171_v11 = vshrl.u32 %v170_v7, 7  ;;  %s243_s4 = scalar_lea.hbm %s698_s2, %s345_s29  ;;  %s229_s5 = scalar_lea.sflag [#allocation6], %s643_s18 }
  0x32   : > { %411 = vlog2.f32 %v158_v1  ;;  %v169_v10 = vunpack.c.0.s8 %v168_v6  ;;  %s451_s6 = scalar_lea.vmem %s246_s28, 128  ;;  %s538_s7 = smov [#allocation7]  }
  0x33   : > { %p452_p8 = scmp.ne.s32.totalorder %s246_s28, %s451_s6  ;;  %s455_s8 = sshll.u32 %s538_s7, 4  ;;  %s456_s8 = int_to_ptr.vmem [resolvable:$false] %s455_s8 }
  0x34   : > { %v172_v12 = vsub.s32 %v169_v10, %v171_v11  ;;  %s457_s9 = scalar_lea.vmem %s456_s8, 256  ;;  %p458_p0 = scmp.lt.s32.totalorder %s246_s28, %s456_s8 }
  0x35   : > { %v161_v3 = vstv %s156_s27  ;;  %p453_p11 = pnand %p452_p8, %p608_p9  ;;  %p459_p1 = scmp.lt.s32.totalorder %s457_s9, %s451_s6 }
  0x36   : > { %v173_v14 = vrot.slane %v157_v0, %v172_v12  ;;  %v180_v15 = vrot.slane %v166_v13, %v172_v12 }
  0x37   : > { %p454_p12 = pneg %p453_p11  ;;  %p460_p2 = por %p459_p1, %p458_p0 }
  0x38   : > { %v181_v16 = vcombine.high %v173_v14, %v173_v14  ;;  %v182_v17 = vcombine.high %v180_v15, %v180_v15  ;;  %v183_v18 = vand.u32 2147483648, %v173_v14  ;;  %v185_v21 = vand.u32 2147483648, %v180_v15 }
  0x39   : > { %p461_p3 = pnand %p460_p2, %p454_p12 }
  0x3a   : > { %v184_v20 = vand.u32 2147483648, %v181_v16  ;;  %v186_v24 = vand.u32 2147483648, %v182_v17 }
  0x3f   : > { %v412_v2 = vpop.eup %411 }
  0x40   : > { %v160_v4 = vmul.f32 0.6931472, %v412_v2 }
  0x42   : > { %v162_v8 = vmul.f32 %v161_v3, %v160_v4 }
  0x44   : > { %v163_v9 = vmul.f32 1.442695, %v162_v8 }
  0x46   : > { %413 = vpow2.f32 %v163_v9 }
  0x53   : > { %v414_v19 = vpop.eup %413 }
  0x54   : > { %v188_v22 = vcombine.high %v414_v19, %v414_v19  ;;  %v195_v23 = vrot.slane %v414_v19, %v172_v12 }
  0x56   : > { %v202_v25 = vrot.slane %v188_v22, %v172_v12  ;;  %v203_v26 = vcombine.high %v195_v23, %v195_v23  ;;  %v205_v27 = vor.u32 %v195_v23, %v183_v18 }
  0x58   : > { %v204_v28 = vcombine.high %v202_v25, %v202_v25  ;;  %v206_v29 = vor.u32 %v203_v26, %v184_v20  ;;  %v207_v30 = vor.u32 %v202_v25, %v185_v21 }
  0x5a   : > { %v208_v31 = vor.u32 %v204_v28, %v186_v24  ;;  %v209_v32 = vcombine.low %v205_v27, %v206_v29 }
  0x5c   : > { %v210_v33 = vcombine.low %v207_v30, %v208_v31  ;;  %v217_v34 = vrot.slane %v209_v32, %v172_v12 }
  0x5e   : > { %v224_v35 = vrot.slane %v210_v33, %v172_v12 }
  0x60   : > { %v225_v36 = vcombine.low %v217_v34, %v224_v35 }
  0x62   : > { %227 = vst [vmem:[%s155_s23] sm:$0xff] %v225_v36 }
  0x63   : > { %464 = shalt.err (!%p461_p3)
}
  0x64   : > { %s465_s15 = scalar_lea.hbm %s243_s4, 128  ;;  %s469_s0 = scalar_lea.hbm %s698_s2, 256 }
  0x65   : > { %p466_p5 = scmp.ne.s32.totalorder %s243_s4, %s465_s15  ;;  %p470_p10 = scmp.lt.s32.totalorder %s243_s4, %s698_s2 }
  0x66   : > { %p471_p4 = scmp.lt.s32.totalorder %s469_s0, %s465_s15 }
  0x67   : > { %p467_p6 = pnand %p466_p5, %p608_p9 }
  0x68   : > { %p472_p13 = por %p471_p4, %p470_p10 }
  0x69   : > { %p468_p7 = pneg %p467_p6 }
  0x6b   : > { %p473_p8 = pnand %p472_p13, %p468_p7 }
  0x6d   : > { %476 = shalt.err (!%p473_p8)
}
  0x6e   : > { %348 = dma.vmem_to_hbm [thread:$0]  (%p608_p9), %s246_s28, 128, %s243_s4, %s229_s5  }
  0x6f PF: > { %s257_s21 = sand.u32 1, %s513_s12   ;;  %p704_p11 = scmp.ne.s32.totalorder %s702_s26, 0 }
  0x70   : > { %p705_p12 = scmp.ge.s32.totalorder %s533_s17, 2  ;;  %s258_s22 = scalar_lea.sflag [#allocation6], %s257_s21 }
  0x72   : > { %p355_p0 = pnand %p705_p12, %p704_p11 }
  0x74   : > { %p356_p1 = pneg %p355_p0 }
  0x76   : > { %508 = dma.done.wait (%p356_p1), %s258_s22, 128  }
  0x77   : > { %510 = vsyncadd (%p356_p1), %s258_s22, 4294967168  ;;  %s22_s17 = sadd.s32 1, %s533_s17   ;;  %s706_s12 = smov %s517_s13 }
  0x78   : > { %p19_p2 = scmp.ge.s32.totalorder %s22_s17, 4   ;;  %s707_s13 = smov %s521_s14 }
  0x79   : > { %s708_s14 = smov %s613_s25  ;;  %s709_s15 = smov %s529_s16 }
  0x7a   : > { %s710_s16 = smov %s712_s19  ;;  %21 = sbr.rel (!%p19_p2) target bundleno = 11 (0xb), region = 69 }
  0x7f   :  { %263 = vsyncpa [#allocation5], 1 }
  0x80   :  { %265 = vsyncpa [#allocation5 + $0x1], 1 }
  0x81   :  { %266 = vsyncpa [#allocation6], 1 }
  0x82   :  { %268 = vsyncpa [#allocation6 + $0x1], 1 }

</bundles_post_ra>
